<compile_context>
chip_gen: v6e
topology: v6e:2x2x1
jax: 0.10.0
libtpu: 0.0.40
codegen_flags: <defaults>
</compile_context>

<pallas_src>
import jax
import jax.numpy as jnp
from jax import lax
from jax.experimental import pallas as pl
from jax.experimental.pallas import tpu as pltpu


def _round_up(x, m):
    return ((x + m - 1) // m) * m


def _distance_classifier_kernel(x1_ref, x2_ref, w1a_ref, w1b_ref, b1_ref,
                                w2_ref, b2_ref, o_ref):
    # fc1 over the concatenated input (split-weight form) + bias, then ReLU.
    h = (jnp.dot(x1_ref[...], w1a_ref[...], preferred_element_type=jnp.float32)
         + jnp.dot(x2_ref[...], w1b_ref[...], preferred_element_type=jnp.float32)
         + b1_ref[...])
    h = jnp.maximum(h, 0.0)
    # TODO(synk): dropout is identity in eval mode; training-mode dropout
    # (RNG mask via pltpu.prng_random_bits) is not implemented here.
    # fc2: contract hidden of w2_row [1, H] with hidden of h [TILE_B, H]
    # -> [1, TILE_B] lane-dense row (contiguous, unmasked store).
    y = lax.dot_general(w2_ref[...], h,
                        dimension_numbers=(((1,), (1,)), ((), ())),
                        preferred_element_type=jnp.float32)
    y = y + b2_ref[0]                       # b2 scalar from SMEM
    # Exact sigmoid (pl.reciprocal(..., approx=True) could ride the EUP, but
    # the ~1e-4 error would break the 1e-5 self-test and this epilogue is
    # negligible vs. the input DMAs).
    o_ref[...] = (1.0 / (1.0 + jnp.exp(-y))).astype(o_ref.dtype)


def distance_classifier_forward(input1, input2, w1, b1, w2, b2,
                                *, max_tile_b=512):
    """input1, input2: [B, D] each (input_size = 2*D).
    w1: [input_size, hidden], b1: [hidden], w2: [hidden, 1], b2: [1].
    max_tile_b must be a multiple of 128 (the actual tile is clamped to a
    multiple of 8 when a single tile covers the whole batch)."""
    B, D = input1.shape
    hidden = w1.shape[1]
    assert w1.shape[0] == 2 * D
    assert max_tile_b % 128 == 0

    # Batch tile: largest multiple of 8 covering the batch, capped at
    # max_tile_b.  The kernel is memory-bound, so large tiles amortize the
    # ~0.35us/step grid overhead; the per-tile footprint
    # (2 inputs x 2 pipeline buffers x TILE_B x D x 4B) stays far below the
    # scoped VMEM limit at these sizes.  If D grows large (especially on
    # 64-MiB-VMEM v7x), raise vmem_limit_bytes or shrink max_tile_b.
    tile_b = min(max_tile_b, _round_up(B, 8))
    num_tiles = pl.cdiv(B, tile_b)
    b_pad = num_tiles * tile_b
    if b_pad != B:
        input1 = jnp.pad(input1, ((0, b_pad - B), (0, 0)))
        input2 = jnp.pad(input2, ((0, b_pad - B), (0, 0)))

    # Split fc1's weight so the concat never materializes; present fc2's
    # weight as a [1, hidden] row and its bias as an SMEM scalar.
    w1a = w1[:D, :]
    w1b = w1[D:, :]
    b1_2d = b1.reshape(1, hidden)
    w2_row = w2.reshape(1, hidden)
    b2_1d = b2.reshape(1)

    resident = lambda shape: pl.BlockSpec(shape, lambda i: (0, 0))

    out = pl.pallas_call(
        _distance_classifier_kernel,
        out_shape=jax.ShapeDtypeStruct((1, b_pad), jnp.float32),
        grid=(num_tiles,),
        in_specs=[
            pl.BlockSpec((tile_b, D), lambda i: (i, 0)),        # input1 tile
            pl.BlockSpec((tile_b, D), lambda i: (i, 0)),        # input2 tile
            resident((D, hidden)),                              # W1[:D]
            resident((D, hidden)),                              # W1[D:]
            resident((1, hidden)),                              # b1
            resident((1, hidden)),                              # W2 as a row
            pl.BlockSpec(memory_space=pltpu.MemorySpace.SMEM),  # b2 scalar
        ],
        out_specs=pl.BlockSpec((1, tile_b), lambda i: (0, i)),  # lane-dense
        compiler_params=pltpu.CompilerParams(
            dimension_semantics=("parallel",)),
    )(input1, input2, w1a, w1b, b1_2d, w2_row, b2_1d)

    return out[0, :B].reshape(B, 1)


def _reference(input1, input2, w1, b1, w2, b2):
    x = jnp.concatenate([input1, input2], axis=1)
    h = jnp.maximum(x @ w1 + b1, 0.0)
    return jax.nn.sigmoid(h @ w2 + b2)


if __name__ == "__main__":
    def make_case(key, B, D, hidden):
        k1, k2, k3, k4, k5, k6 = jax.random.split(key, 6)
        input1 = jax.random.normal(k1, (B, D), dtype=jnp.float32)
        input2 = jax.random.normal(k2, (B, D), dtype=jnp.float32)
        w1 = jax.random.normal(k3, (2 * D, hidden), dtype=jnp.float32) * 0.1
        b1 = jax.random.normal(k4, (hidden,), dtype=jnp.float32) * 0.1
        w2 = jax.random.normal(k5, (hidden, 1), dtype=jnp.float32) * 0.1
        b2 = jax.random.normal(k6, (1,), dtype=jnp.float32) * 0.1
        return input1, input2, w1, b1, w2, b2

    # Case 1: small shapes matching the module spec (single tile).
    args = make_case(jax.random.PRNGKey(0), B=8, D=16, hidden=32)
    out = jax.block_until_ready(distance_classifier_forward(*args))
    ref = _reference(*args)
    assert out.shape == (8, 1)
    assert jnp.allclose(out, ref, atol=1e-5, rtol=1e-5)

    # Case 2: multi-tile grid with batch padding (exercises the pipelined,
    # weight-resident path and the lane-dense output writeback).
    args2 = make_case(jax.random.PRNGKey(1), B=300, D=16, hidden=32)
    out2 = jax.block_until_ready(
        distance_classifier_forward(*args2, max_tile_b=128))
    ref2 = _reference(*args2)
    assert out2.shape == (300, 1)
    assert jnp.allclose(out2, ref2, atol=1e-5, rtol=1e-5)

    print("KERNEL_OK")
</pallas_src>

<mosaic_0001>
module attributes {stable_mosaic.version = 11 : i64} {
  func.func @_distance_classifier_kernel(%arg0: i32, %arg1: memref<8x16xf32, #tpu.memory_space<vmem>>, %arg2: memref<8x16xf32, #tpu.memory_space<vmem>>, %arg3: memref<16x32xf32, #tpu.memory_space<vmem>>, %arg4: memref<16x32xf32, #tpu.memory_space<vmem>>, %arg5: memref<1x32xf32, #tpu.memory_space<vmem>>, %arg6: memref<1x32xf32, #tpu.memory_space<vmem>>, %arg7: memref<1xf32, #tpu.memory_space<smem>>, %arg8: memref<1x8xf32, #tpu.memory_space<vmem>>) attributes {dimension_semantics = [#tpu.dimension_semantics<parallel>], iteration_bounds = array<i64: 1>, scalar_prefetch = 0 : i64, scratch_operands = 0 : i64, tpu.core_type = #tpu.core_type<tc>, window_params = [{transform_indices = @transform_0, window_bounds = array<i64: 8, 16>}, {transform_indices = @transform_1, window_bounds = array<i64: 8, 16>}, {pipeline_mode = #tpu.pipeline_mode<synchronous>, transform_indices = @transform_2, window_bounds = array<i64: 16, 32>}, {pipeline_mode = #tpu.pipeline_mode<synchronous>, transform_indices = @transform_3, window_bounds = array<i64: 16, 32>}, {pipeline_mode = #tpu.pipeline_mode<synchronous>, transform_indices = @transform_4, window_bounds = array<i64: 1, 32>}, {pipeline_mode = #tpu.pipeline_mode<synchronous>, transform_indices = @transform_5, window_bounds = array<i64: 1, 32>}, {transform_indices = @transform_6, window_bounds = array<i64: 1>}, {transform_indices = @transform_7, window_bounds = array<i64: 1, 8>}]} {
    %c0 = arith.constant 0 : index
    %c0_0 = arith.constant 0 : index
    %0 = vector.load %arg1[%c0, %c0_0] : memref<8x16xf32, #tpu.memory_space<vmem>>, vector<8x16xf32>
    %c0_1 = arith.constant 0 : index
    %c0_2 = arith.constant 0 : index
    %1 = vector.load %arg3[%c0_1, %c0_2] : memref<16x32xf32, #tpu.memory_space<vmem>>, vector<16x32xf32>
    %cst = arith.constant dense<0.000000e+00> : vector<8x32xf32>
    %2 = tpu.matmul %0, %1, %cst {dimension_numbers = #tpu.dot_dimension_numbers<[1], [0], [0], [1], [0, 0, 1, 1], [], []>} : vector<8x16xf32>, vector<16x32xf32>, vector<8x32xf32> -> vector<8x32xf32>
    %c0_3 = arith.constant 0 : index
    %c0_4 = arith.constant 0 : index
    %3 = vector.load %arg2[%c0_3, %c0_4] : memref<8x16xf32, #tpu.memory_space<vmem>>, vector<8x16xf32>
    %c0_5 = arith.constant 0 : index
    %c0_6 = arith.constant 0 : index
    %4 = vector.load %arg4[%c0_5, %c0_6] : memref<16x32xf32, #tpu.memory_space<vmem>>, vector<16x32xf32>
    %cst_7 = arith.constant dense<0.000000e+00> : vector<8x32xf32>
    %5 = tpu.matmul %3, %4, %cst_7 {dimension_numbers = #tpu.dot_dimension_numbers<[1], [0], [0], [1], [0, 0, 1, 1], [], []>} : vector<8x16xf32>, vector<16x32xf32>, vector<8x32xf32> -> vector<8x32xf32>
    %6 = arith.addf %2, %5 : vector<8x32xf32>
    %c0_8 = arith.constant 0 : index
    %c0_9 = arith.constant 0 : index
    %7 = vector.load %arg5[%c0_8, %c0_9] : memref<1x32xf32, #tpu.memory_space<vmem>>, vector<1x32xf32>
    %8 = vector.broadcast %7 : vector<1x32xf32> to vector<8x32xf32>
    %9 = arith.addf %6, %8 : vector<8x32xf32>
    %cst_10 = arith.constant 0.000000e+00 : f32
    %10 = vector.broadcast %cst_10 : f32 to vector<8x32xf32>
    %11 = arith.maximumf %9, %10 : vector<8x32xf32>
    %c0_11 = arith.constant 0 : index
    %c0_12 = arith.constant 0 : index
    %12 = vector.load %arg6[%c0_11, %c0_12] : memref<1x32xf32, #tpu.memory_space<vmem>>, vector<1x32xf32>
    %cst_13 = arith.constant dense<0.000000e+00> : vector<1x8xf32>
    %13 = tpu.matmul %12, %11, %cst_13 {dimension_numbers = #tpu.dot_dimension_numbers<[1], [1], [0], [0], [0, 0, 1, 0], [], []>} : vector<1x32xf32>, vector<8x32xf32>, vector<1x8xf32> -> vector<1x8xf32>
    %c0_14 = arith.constant 0 : index
    %14 = memref.load %arg7[%c0_14] : memref<1xf32, #tpu.memory_space<smem>>
    %15 = vector.broadcast %14 : f32 to vector<1x8xf32>
    %16 = arith.addf %13, %15 : vector<1x8xf32>
    %cst_15 = arith.constant 0.000000e+00 : f32
    %17 = vector.broadcast %cst_15 : f32 to vector<1x8xf32>
    %18 = arith.subf %17, %16 : vector<1x8xf32>
    %19 = math.exp %18 : vector<1x8xf32>
    %cst_16 = arith.constant 1.000000e+00 : f32
    %20 = vector.broadcast %cst_16 : f32 to vector<1x8xf32>
    %21 = arith.addf %20, %19 : vector<1x8xf32>
    %cst_17 = arith.constant 1.000000e+00 : f32
    %22 = vector.broadcast %cst_17 : f32 to vector<1x8xf32>
    %23 = arith.divf %22, %21 : vector<1x8xf32>
    %c0_18 = arith.constant 0 : index
    %c0_19 = arith.constant 0 : index
    %24 = vector.load %arg8[%c0_18, %c0_19] : memref<1x8xf32, #tpu.memory_space<vmem>>, vector<1x8xf32>
    tpu.vector_store %arg8[%c0_18, %c0_19], %23 {strides = array<i32>} : memref<1x8xf32, #tpu.memory_space<vmem>>, vector<1x8xf32>,
    return
  }
  func.func @transform_0(%arg0: i32) -> (i32, i32) {
    %c0_i32 = arith.constant 0 : i32
    %c0_i32_0 = arith.constant 0 : i32
    return %arg0, %c0_i32 : i32, i32
  }
  func.func @transform_1(%arg0: i32) -> (i32, i32) {
    %c0_i32 = arith.constant 0 : i32
    %c0_i32_0 = arith.constant 0 : i32
    return %arg0, %c0_i32 : i32, i32
  }
  func.func @transform_2(%arg0: i32) -> (i32, i32) {
    %c0_i32 = arith.constant 0 : i32
    %c0_i32_0 = arith.constant 0 : i32
    %c0_i32_1 = arith.constant 0 : i32
    return %c0_i32, %c0_i32_0 : i32, i32
  }
  func.func @transform_3(%arg0: i32) -> (i32, i32) {
    %c0_i32 = arith.constant 0 : i32
    %c0_i32_0 = arith.constant 0 : i32
    %c0_i32_1 = arith.constant 0 : i32
    return %c0_i32, %c0_i32_0 : i32, i32
  }
  func.func @transform_4(%arg0: i32) -> (i32, i32) {
    %c0_i32 = arith.constant 0 : i32
    %c0_i32_0 = arith.constant 0 : i32
    %c0_i32_1 = arith.constant 0 : i32
    return %c0_i32, %c0_i32_0 : i32, i32
  }
  func.func @transform_5(%arg0: i32) -> (i32, i32) {
    %c0_i32 = arith.constant 0 : i32
    %c0_i32_0 = arith.constant 0 : i32
    %c0_i32_1 = arith.constant 0 : i32
    return %c0_i32, %c0_i32_0 : i32, i32
  }
  func.func @transform_6(%arg0: i32) -> i32 {
    %c0_i32 = arith.constant 0 : i32
    %c0_i32_0 = arith.constant 0 : i32
    return %c0_i32 : i32
  }
  func.func @transform_7(%arg0: i32) -> (i32, i32) {
    %c0_i32 = arith.constant 0 : i32
    %c0_i32_0 = arith.constant 0 : i32
    return %c0_i32, %arg0 : i32, i32
  }
}

</mosaic_0001>

<bundles_post_ra>
// kernel: tpu_custom_call.1
= control target key start
LH: loop header
LB: loop body
LE: loop exit
PB: predicated region body
PF: predicated region fallthrough
CT: control target
= control target key end

     0   :  { %13 = vsyncpa [#allocation4], 0  ;;  %s575_s0 = inlined_call_operand.hbm [shape: f32[8,16], index: 0, kind: input, shape index: {}]   ;;  %s576_s1 = inlined_call_operand.hbm [shape: f32[8,16], index: 1, kind: input, shape index: {}]   ;;  %s577_s2 = inlined_call_operand.hbm [shape: f32[16,32], index: 2, kind: input, shape index: {}]   ;;  %s578_s3 = inlined_call_operand.hbm [shape: f32[16,32], index: 3, kind: input, shape index: {}]   ;;  %s579_s4 = inlined_call_operand.vmem [shape: f32[1,32], index: 4, kind: input, shape index: {}]   ;;  %s580_s5 = inlined_call_operand.vmem [shape: f32[1,32], index: 5, kind: input, shape index: {}]   ;;  %s581_s6 = inlined_call_operand.<no memory space> [shape: f32[1], index: 6, kind: input, shape index: {}]   ;;  %s582_s7 = inlined_call_operand.hbm [shape: f32[1,8], index: 7, kind: output, shape index: {}]  }
   0x1   :  { %14 = vsyncpa [#allocation7], 0 }
   0x2   :  { %15 = vsyncpa [#allocation10], 0 }
   0x3   :  { %16 = vsyncpa [#allocation5], 0  ;;  %s499_s24 = smov [#allocation6]   ;;  %s500_s26 = smov [#allocation3]  }
   0x4   :  { %s33_s25 = sshll.u32 %s499_s24, 4  ;;  %s23_s27 = sshll.u32 %s500_s26, 4  ;;  %s34_s25 = int_to_ptr.vmem [resolvable:$true] %s33_s25  ;;  %s24_s27 = int_to_ptr.vmem [resolvable:$true] %s23_s27 }
   0x5   :  { %s399_s28 = scalar_lea.vmem %s34_s25, 128  ;;  %p404_p1 = scmp.lt.s32.totalorder %s34_s25, %s34_s25 }
   0x6   :  { %p400_p0 = scmp.ne.s32.totalorder %s34_s25, %s399_s28  ;;  %p405_p2 = scmp.lt.s32.totalorder %s399_s28, %s399_s28 }
   0x8   :  { %p406_p3 = por %p405_p2, %p404_p1 }
   0xa   :  { %p407_p4 = pnand %p406_p3, %p400_p0 }
   0xc   :  { %410 = shalt.err (!%p407_p4)
}
   0xd   :  { %36 = dma.hbm_to_vmem [thread:$0]  %s576_s1, 128, %s34_s25, [#allocation7]  }
   0xe   :  { %s419_s8 = scalar_lea.vmem %s24_s27, 128  ;;  %p424_p6 = scmp.lt.s32.totalorder %s24_s27, %s24_s27 }
   0xf   :  { %p420_p5 = scmp.ne.s32.totalorder %s24_s27, %s419_s8  ;;  %p425_p7 = scmp.lt.s32.totalorder %s419_s8, %s419_s8 }
  0x11   :  { %p426_p8 = por %p425_p7, %p424_p6 }
  0x13   :  { %p427_p9 = pnand %p426_p8, %p420_p5 }
  0x15   :  { %430 = shalt.err (!%p427_p9)
}
  0x16   :  { %26 = dma.hbm_to_vmem [thread:$0]  %s575_s0, 128, %s24_s27, [#allocation4]  }
  0x17   :  { %s501_s11 = smov [#allocation8]  }
  0x18   :  { %s42_s12 = sshll.u32 %s501_s11, 4  ;;  %s43_s12 = int_to_ptr.vmem [resolvable:$true] %s42_s12 }
  0x19   :  { %s439_s13 = scalar_lea.vmem %s43_s12, 256  ;;  %p444_p11 = scmp.lt.s32.totalorder %s43_s12, %s43_s12 }
  0x1a   :  { %p440_p10 = scmp.ne.s32.totalorder %s43_s12, %s439_s13  ;;  %p445_p12 = scmp.lt.s32.totalorder %s439_s13, %s439_s13 }
  0x1c   :  { %p446_p13 = por %p445_p12, %p444_p11 }
  0x1e   :  { %p447_p0 = pnand %p446_p13, %p440_p10 }
  0x20   :  { %450 = shalt.err (!%p447_p0)
}
  0x21   :  { %s502_s1 = smov 128   ;;  %s503_s14 = smov 8  }
  0x22   :  { %48 = dma.hbm_to_vmem [thread:$0]  %s577_s2, 256, %s43_s12, [#allocation7], %s502_s1, %s502_s1, %s503_s14  }
  0x23   :  { %s504_s17 = smov [#allocation9]  }
  0x24   :  { %s54_s18 = sshll.u32 %s504_s17, 4  ;;  %s55_s18 = int_to_ptr.vmem [resolvable:$true] %s54_s18 }
  0x25   :  { %s459_s0 = scalar_lea.vmem %s55_s18, 256  ;;  %p464_p2 = scmp.lt.s32.totalorder %s55_s18, %s55_s18 }
  0x26   :  { %p460_p1 = scmp.ne.s32.totalorder %s55_s18, %s459_s0  ;;  %p465_p3 = scmp.lt.s32.totalorder %s459_s0, %s459_s0 }
  0x28   :  { %p466_p4 = por %p465_p3, %p464_p2 }
  0x2a   :  { %p467_p5 = pnand %p466_p4, %p460_p1 }
  0x2c   :  { %470 = shalt.err (!%p467_p5)
}
  0x2d   :  { %60 = dma.hbm_to_vmem [thread:$0]  %s578_s3, 256, %s55_s18, [#allocation10], %s502_s1, %s502_s1, %s503_s14  }
  0x2e   :  { %491 = dma.done.wait [#allocation4], 128  }
  0x2f   :  { %492 = vsyncadd [#allocation4], 4294967168 }
  0x30   :  { %493 = dma.done.wait [#allocation7], 384  }
  0x31   :  { %494 = vsyncadd [#allocation7], 4294966912 }
  0x32   :  { %495 = dma.done.wait [#allocation10], 256  }
  0x33   :  { %496 = vsyncadd [#allocation10], 4294967040  ;;  %v505_v0 = vmov 0.0   ;;  %vm506_vm0 = vmmov 0   ;;  %v84_v1 = vld [vmem:[#allocation9 + $0x8] sm:$0xff]  ;;  %v81_v2 = vld [vmem:[#allocation8 + $0x8] sm:$0xff]  ;;  %v243_v16 = vstv %s581_s6 }
  0x34   :  { %359 = vmatprep.subr.mxu0 %v505_v0  ;;  %366 = vmatprep.subr.mxu1 %v505_v0  ;;  %v83_v3 = vld [vmem:[#allocation9] sm:$0xff]  ;;  %v80_v4 = vld [vmem:[#allocation8] sm:$0xff]  ;;  %v82_v5 = vld [vmem:[#allocation6] sm:$0xff]  ;;  %vm85_vm1 = vcmask 130048   ;;  %vm244_vm2 = vcmask 261120   ;;  %vm327_vm3 = vcmask 57344  }
  0x35   :  { %363 = vmatprep.mubr.msk.f32.mxu0 %vm506_vm0, %v505_v0  ;;  %370 = vmatprep.mubr.msk.f32.mxu1 %vm506_vm0, %v505_v0  ;;  %v79_v6 = vld [vmem:[#allocation3] sm:$0xff] }
  0x36   :  { %360 = vmatpush3.msra.mxu0 %v84_v1  ;;  %367 = vmatpush3.msra.mxu1 %v81_v2  ;;  %v348_v9 = vld [vmem:[%s579_s4] ss:$0 sm:$0xff]  ;;  %s507_s4 = smov [#allocation11]  }
  0x37   :  { %361 = vmatprep.subr.mxu0 %v505_v0  ;;  %368 = vmatprep.subr.mxu1 %v505_v0  ;;  %v241_v15 = vld [vmem:[%s580_s5] sm:$0x1]  ;;  %s335_s25 = sshll.u32 %s507_s4, 4  ;;  %s336_s25 = int_to_ptr.vmem [resolvable:$true] %s335_s25 }
  0x38   :  { %362 = vmatpush3.msra.mxu0 %v83_v3  ;;  %369 = vmatpush3.msra.mxu1 %v80_v4  ;;  %s471_s5 = scalar_lea.vmem %s336_s25, 16  ;;  %s475_s26 = scalar_lea.vmem %s336_s25, 32 }
  0x39   :  { %364 = vmatmul.mubr.msk.f32.vlgmr.msra.gmra.mxu0 %vm85_vm1, %v82_v5  ;;  %371 = vmatmul.mubr.msk.f32.vlgmr.msra.gmra.mxu1 %vm85_vm1, %v79_v6  ;;  %p472_p6 = scmp.ne.s32.totalorder %s336_s25, %s471_s5  ;;  %p476_p7 = scmp.lt.s32.totalorder %s336_s25, %s336_s25 }
  0x3a   :  { %373 = vmatprep.subr.mxu0 %v505_v0  ;;  %375 = vmatprep.mubr.msk.f32.mxu0 %vm506_vm0, %v505_v0  ;;  %p477_p8 = scmp.lt.s32.totalorder %s475_s26, %s471_s5 }
  0x3c   :  { %p478_p9 = por %p477_p8, %p476_p7 }
  0x3e   :  { %p479_p10 = pnand %p478_p9, %p472_p6 }
  0xf9   :  { %v155_v7 = vpop.f32.mrf.mxu0  ;;  %v228_v8 = vpop.f32.mrf.mxu1 }
  0xfa   :  { %v229_v10 = vadd.f32 %v228_v8, %v155_v7 }
  0xfb   :  { %v365_v11 = vpop.f32.mrf.mxu0  ;;  %v372_v12 = vpop.f32.mrf.mxu1 }
  0xfc   :  { %v239_v13 = vadd.f32 %v348_v9, %v229_v10 }
  0xfe   :  { %v240_v14 = vmax.f32 %v239_v13, 0.0 }
 0x100   :  { %374 = vmatpush3.xpose.msk.msra.mxu0 %vm244_vm2, %v240_v14 }
 0x103   :  { %376 = vmatmul.mubr.msk.f32.vlgmr.msra.gmra.mxu0 %vm244_vm2, %v241_v15 }
 0x1c3   :  { %v317_v17 = vpop.f32.mrf.mxu0 }
 0x1c4   :  { %v318_v18 = vadd.f32 %v317_v17, %v243_v16 }
 0x1c5   :  { %v377_v19 = vpop.f32.mrf.mxu0 }
 0x1c6   :  { %v321_v20 = vsub.f32 0.0, %v318_v18 }
 0x1c8   :  { %v322_v21 = vmul.f32 1.442695, %v321_v20 }
 0x1ca   :  { %387 = vpow2.f32 %v322_v21 }
 0x1d7   :  { %v388_v22 = vpop.eup %387 }
 0x1d8   :  { %v324_v23 = vadd.f32 1.0, %v388_v22 }
 0x1da   :  { %389 = vrcp.f32 %v324_v23 }
 0x1e7   :  { %v390_v24 = vpop.eup %389 }
 0x1e8   :  { %328 = vst.msk [vmem:[#allocation11] sm:$0x1] %vm327_vm3, %v390_v24 }
 0x1e9   :  { %482 = shalt.err (!%p479_p10)
}
 0x1ea   :  { %338 = dma.vmem_to_hbm [thread:$0]  %s336_s25, 16, %s582_s7, [#allocation5]  }
 0x1eb   :  { %497 = dma.done.wait [#allocation5], 16  }
 0x1ec   :  { %498 = vsyncadd [#allocation5], 4294967280 }
 0x1ed   :  { %342 = vsyncpa [#allocation4], 1 }
 0x1ee   :  { %343 = vsyncpa [#allocation7], 1 }
 0x1ef   :  { %344 = vsyncpa [#allocation10], 1 }
 0x1f0   :  { %345 = vsyncpa [#allocation5], 1 }

</bundles_post_ra>
